<compile_context>
chip_gen: v7x
topology: tpu7x:2x2x1
jax: 0.10.0
libtpu: 0.0.40
codegen_flags: <defaults>
</compile_context>

<pallas_src>
import jax
import jax.numpy as jnp
import numpy as np
from jax.experimental import pallas as pl
from jax.experimental.pallas import tpu as pltpu

NUM_CLASSES = 6                      # 5 mapped elements + 1 "other" bucket
_ATOMIC_NUMS = (6, 7, 8, 15, 16)     # -> columns 0..4; everything else -> 5
_SPLIT_THRESHOLD = 512               # below this, a single grid step is fine


# ----------------------------- Pallas kernel ------------------------------

def _onehot_kernel(atoms_ref, out_ref):
    """atoms_ref: (tile, 1) int32 ; out_ref: (tile, NUM_CLASSES) float-ish."""
    a = atoms_ref[...]                                          # (tile, 1)

    # Vectorized "dict lookup": atomic number -> class index (default = 5).
    idx = jnp.full(a.shape, NUM_CLASSES - 1, dtype=jnp.int32)
    for col, z in enumerate(_ATOMIC_NUMS):
        idx = jnp.where(a == z, col, idx)

    # One-hot via column iota; compact (tile, 6) block -> 24 B/atom writeback.
    cols = jax.lax.broadcasted_iota(jnp.int32, out_ref.shape, 1)
    out_ref[...] = (cols == idx).astype(out_ref.dtype)


# ------------------------------ JAX wrapper -------------------------------

def _round_up(x, m):
    return ((x + m - 1) // m) * m


def _one_hot_jnp(a, out_dtype):
    """Pure-jnp path for small inputs (fuses into the consumer under XLA)."""
    idx = jnp.full(a.shape, NUM_CLASSES - 1, dtype=jnp.int32)
    for col, z in enumerate(_ATOMIC_NUMS):
        idx = jnp.where(a == z, col, idx)
    return jax.nn.one_hot(idx, NUM_CLASSES, dtype=out_dtype)


def atom_one_hot_embed(atomic_numbers, *, row_tile=8192, min_pallas_atoms=1024,
                       out_dtype=jnp.float32):
    """One-hot embed atomic numbers -> (n_atoms, 6) array of `out_dtype`."""
    n_atoms = int(atomic_numbers.shape[0])
    if n_atoms == 0:                                  # empty-input guard
        return jnp.zeros((0, NUM_CLASSES), dtype=out_dtype)

    a = atomic_numbers.astype(jnp.int32)
    if n_atoms < min_pallas_atoms:
        # Launch / pad / slice overhead dominates at tiny sizes.
        return _one_hot_jnp(a, out_dtype)

    a = a.reshape(n_atoms, 1)
    n_pad8 = _round_up(n_atoms, 8)

    if n_pad8 <= _SPLIT_THRESHOLD:
        # Tiny problem: single grid step.
        tile = n_pad8
    else:
        # At least 2 steps so ("parallel",) can use both v7x TensorCores,
        # capped at row_tile to amortize the ~0.35 us/step overhead without
        # blowing the VMEM budget (double-buffered lane-padded input).
        tile = min(row_tile, _round_up((n_pad8 + 1) // 2, 8))

    n_padded = _round_up(n_pad8, tile)
    if n_padded != n_atoms:
        a = jnp.pad(a, ((0, n_padded - n_atoms), (0, 0)))   # pads -> "other"

    grid = (n_padded // tile,)
    out = pl.pallas_call(
        _onehot_kernel,
        out_shape=jax.ShapeDtypeStruct((n_padded, NUM_CLASSES), out_dtype),
        grid_spec=pltpu.PrefetchScalarGridSpec(
            num_scalar_prefetch=0,
            grid=grid,
            in_specs=[pl.BlockSpec((tile, 1), lambda i: (i, 0))],
            out_specs=pl.BlockSpec((tile, NUM_CLASSES), lambda i: (i, 0)),
        ),
        compiler_params=pltpu.CompilerParams(
            dimension_semantics=("parallel",),
            vmem_limit_bytes=32 << 20,
        ),
    )(a)

    if n_padded != n_atoms:
        out = out[:n_atoms]
    return out


# ------------------------------ reference ---------------------------------

def reference_forward(atomic_numbers):
    """NumPy port of the PyTorch loop, used for correctness checking."""
    idx_map = {6: 0, 7: 1, 8: 2, 15: 3, 16: 4}
    a = np.asarray(atomic_numbers)
    out = np.zeros((len(a), NUM_CLASSES), dtype=np.float32)
    for i, j in enumerate(a):
        out[i, idx_map.get(int(j), 5)] = 1.0
    return out


def _check(emb, atoms):
    emb = jax.block_until_ready(emb)
    ref = reference_forward(np.asarray(atoms))
    assert emb.shape == ref.shape, (emb.shape, ref.shape)
    assert jnp.allclose(emb.astype(jnp.float32), jnp.asarray(ref)), "mismatch"
    if emb.shape[0] > 0:
        assert bool(jnp.all(jnp.sum(emb.astype(jnp.float32), axis=1) == 1.0))


# --------------------------------- main -----------------------------------

if __name__ == "__main__":
    key = jax.random.PRNGKey(0)
    # Mix of mapped (C, N, O, P, S) and unmapped (H, Cl) atomic numbers.
    candidates = jnp.array([1, 6, 7, 8, 15, 16, 17], dtype=jnp.int32)

    # 1) Small, ragged size through the Pallas path (forced), single grid step.
    k1, k2 = jax.random.split(key)
    atoms_small = jax.random.choice(k1, candidates, shape=(200,))
    _check(atom_one_hot_embed(atoms_small, min_pallas_atoms=0), atoms_small)

    # 2) Same small size through the pure-jnp fast path (default dispatch).
    _check(atom_one_hot_embed(atoms_small), atoms_small)

    # 3) Larger size: multi-step grid (tile=8192 -> 3 steps), ragged padding.
    atoms_large = jax.random.choice(k2, candidates, shape=(20000,))
    _check(atom_one_hot_embed(atoms_large), atoms_large)

    # 4) Empty input edge case.
    _check(atom_one_hot_embed(jnp.zeros((0,), dtype=jnp.int32)),
           np.zeros((0,), dtype=np.int32))

    print("KERNEL_OK")
</pallas_src>

<mosaic_0001>
module attributes {stable_mosaic.version = 11 : i64} {
  func.func @_onehot_kernel(%arg0: i32, %arg1: memref<200x1xi32, #tpu.memory_space<vmem>>, %arg2: memref<200x6xf32, #tpu.memory_space<vmem>>) attributes {dimension_semantics = [#tpu.dimension_semantics<parallel>], iteration_bounds = array<i64: 1>, scalar_prefetch = 0 : i64, scratch_operands = 0 : i64, tpu.core_type = #tpu.core_type<tc>, window_params = [{transform_indices = @transform_0, window_bounds = array<i64: 200, 1>}, {transform_indices = @transform_1, window_bounds = array<i64: 200, 6>}]} {
    %c0 = arith.constant 0 : index
    %c0_0 = arith.constant 0 : index
    %0 = vector.load %arg1[%c0, %c0_0] : memref<200x1xi32, #tpu.memory_space<vmem>>, vector<200x1xi32>
    %c5_i32 = arith.constant 5 : i32
    %1 = vector.broadcast %c5_i32 : i32 to vector<200x1xi32>
    %c6_i32 = arith.constant 6 : i32
    %2 = vector.broadcast %c6_i32 : i32 to vector<200x1xi32>
    %3 = arith.cmpi eq, %0, %2 : vector<200x1xi32>
    %c0_i32 = arith.constant 0 : i32
    %4 = vector.broadcast %c0_i32 : i32 to vector<200x1xi32>
    %5 = arith.select %3, %4, %1 : vector<200x1xi1>, vector<200x1xi32>
    %c7_i32 = arith.constant 7 : i32
    %6 = vector.broadcast %c7_i32 : i32 to vector<200x1xi32>
    %7 = arith.cmpi eq, %0, %6 : vector<200x1xi32>
    %c1_i32 = arith.constant 1 : i32
    %8 = vector.broadcast %c1_i32 : i32 to vector<200x1xi32>
    %9 = arith.select %7, %8, %5 : vector<200x1xi1>, vector<200x1xi32>
    %c8_i32 = arith.constant 8 : i32
    %10 = vector.broadcast %c8_i32 : i32 to vector<200x1xi32>
    %11 = arith.cmpi eq, %0, %10 : vector<200x1xi32>
    %c2_i32 = arith.constant 2 : i32
    %12 = vector.broadcast %c2_i32 : i32 to vector<200x1xi32>
    %13 = arith.select %11, %12, %9 : vector<200x1xi1>, vector<200x1xi32>
    %c15_i32 = arith.constant 15 : i32
    %14 = vector.broadcast %c15_i32 : i32 to vector<200x1xi32>
    %15 = arith.cmpi eq, %0, %14 : vector<200x1xi32>
    %c3_i32 = arith.constant 3 : i32
    %16 = vector.broadcast %c3_i32 : i32 to vector<200x1xi32>
    %17 = arith.select %15, %16, %13 : vector<200x1xi1>, vector<200x1xi32>
    %c16_i32 = arith.constant 16 : i32
    %18 = vector.broadcast %c16_i32 : i32 to vector<200x1xi32>
    %19 = arith.cmpi eq, %0, %18 : vector<200x1xi32>
    %c4_i32 = arith.constant 4 : i32
    %20 = vector.broadcast %c4_i32 : i32 to vector<200x1xi32>
    %21 = arith.select %19, %20, %17 : vector<200x1xi1>, vector<200x1xi32>
    %22 = tpu.iota {dimensions = array<i32: 1>} : vector<200x6xi32>
    %23 = vector.broadcast %21 : vector<200x1xi32> to vector<200x6xi32>
    %24 = arith.cmpi eq, %22, %23 : vector<200x6xi32>
    %25 = arith.extui %24 : vector<200x6xi1> to vector<200x6xi32>
    %26 = arith.sitofp %25 : vector<200x6xi32> to vector<200x6xf32>
    %c0_1 = arith.constant 0 : index
    %c0_2 = arith.constant 0 : index
    %27 = vector.load %arg2[%c0_1, %c0_2] : memref<200x6xf32, #tpu.memory_space<vmem>>, vector<200x6xf32>
    tpu.vector_store %arg2[%c0_1, %c0_2], %26 {strides = array<i32>} : memref<200x6xf32, #tpu.memory_space<vmem>>, vector<200x6xf32>,
    return
  }
  func.func @transform_0(%arg0: i32) -> (i32, i32) {
    %c0_i32 = arith.constant 0 : i32
    %c0_i32_0 = arith.constant 0 : i32
    return %arg0, %c0_i32 : i32, i32
  }
  func.func @transform_1(%arg0: i32) -> (i32, i32) {
    %c0_i32 = arith.constant 0 : i32
    %c0_i32_0 = arith.constant 0 : i32
    return %arg0, %c0_i32 : i32, i32
  }
}

</mosaic_0001>

<bundles_post_ra>
// kernel: tpu_custom_call.1
= control target key start
LH: loop header
LB: loop body
LE: loop exit
PB: predicated region body
PF: predicated region fallthrough
CT: control target
= control target key end

     0   :  { %v495_v0 = vmov 0   ;;  %v496_v4 = vmov 5   ;;  %s763_s0 = inlined_call_operand.vmem [shape: s32[200,1], index: 0, kind: input, shape index: {}]   ;;  %s764_s1 = inlined_call_operand.vmem [shape: f32[200,6], index: 1, kind: output, shape index: {}]  }
   0x1   :  { %494 = vset.pattern.permute.xlu1 %v495_v0  ;;  %493 = vset.pattern.permute.xlu0 %v495_v0  ;;  %v10_v1 = vld [vmem:[%s763_s0 + $0x10] sm:$0xff]  ;;  %v8_v2 = vld [vmem:[%s763_s0] sm:$0xff]  ;;  %v11_v3 = vld [vmem:[%s763_s0 + $0x18] sm:$0xff] }
   0x2   :  { %vm35_vm0 = vcmp.eq.s32.totalorder %v10_v1, 6  ;;  %vm85_vm1 = vcmp.eq.s32.totalorder %v10_v1, 7  ;;  %vm135_vm2 = vcmp.eq.s32.totalorder %v10_v1, 8  ;;  %vm185_vm3 = vcmp.eq.s32.totalorder %v10_v1, 15  ;;  %v9_v13 = vld [vmem:[%s763_s0 + $0x8] sm:$0xff]  ;;  %v12_v23 = vld [vmem:[%s763_s0 + $0x20] sm:$0xff] }
   0x3   :  { %v60_v5 = vsel %vm35_vm0, 0, %v496_v4  ;;  %vm235_vm4 = vcmp.eq.s32.totalorder %v10_v1, 16  ;;  %vm33_vm5 = vcmp.eq.s32.totalorder %v8_v2, 6  ;;  %vm83_vm6 = vcmp.eq.s32.totalorder %v8_v2, 7  ;;  %v13_v19 = vld [vmem:[%s763_s0 + $0x28] sm:$0xff]  ;;  %v15_v29 = vld [vmem:[%s763_s0 + $0x38] sm:$0xff] }
   0x4   :  { %v110_v6 = vsel %vm85_vm1, 1, %v60_v5  ;;  %v58_v7 = vsel %vm33_vm5, 0, %v496_v4  ;;  %vm133_vm7 = vcmp.eq.s32.totalorder %v8_v2, 8  ;;  %vm183_vm8 = vcmp.eq.s32.totalorder %v8_v2, 15  ;;  %v14_v35 = vld [vmem:[%s763_s0 + $0x30] sm:$0xff]  ;;  %v17_v42 = vld [vmem:[%s763_s0 + $0x48] sm:$0xff] }
   0x5   :  { %v160_v8 = vsel %vm135_vm2, 2, %v110_v6  ;;  %v108_v9 = vsel %vm83_vm6, 1, %v58_v7  ;;  %vm233_vm9 = vcmp.eq.s32.totalorder %v8_v2, 16  ;;  %vm36_vm10 = vcmp.eq.s32.totalorder %v11_v3, 6  ;;  %v16_v47 = vld [vmem:[%s763_s0 + $0x40] sm:$0xff]  ;;  %v19_v54 = vld [vmem:[%s763_s0 + $0x58] sm:$0xff] }
   0x6   :  { %v210_v10 = vsel %vm185_vm3, 3, %v160_v8  ;;  %v158_v11 = vsel %vm133_vm7, 2, %v108_v9  ;;  %v61_v12 = vsel %vm36_vm10, 0, %v496_v4  ;;  %vm86_vm11 = vcmp.eq.s32.totalorder %v11_v3, 7  ;;  %v18_v59 = vld [vmem:[%s763_s0 + $0x50] sm:$0xff]  ;;  %v21_v2 = vld [vmem:[%s763_s0 + $0x68] sm:$0xff] }
   0x7   :  { %v260_v14 = vsel %vm235_vm4, 4, %v210_v10  ;;  %v208_v15 = vsel %vm183_vm8, 3, %v158_v11  ;;  %v111_v16 = vsel %vm86_vm11, 1, %v61_v12  ;;  %vm136_vm12 = vcmp.eq.s32.totalorder %v11_v3, 8  ;;  %v20_v8 = vld [vmem:[%s763_s0 + $0x60] sm:$0xff] }
   0x8   :  { %292 = vperm.xlu1 %494, %v260_v14   ;;  %v258_v17 = vsel %vm233_vm9, 4, %v208_v15  ;;  %v161_v18 = vsel %vm136_vm12, 2, %v111_v16  ;;  %vm186_vm13 = vcmp.eq.s32.totalorder %v11_v3, 15  ;;  %vm236_vm14 = vcmp.eq.s32.totalorder %v11_v3, 16  ;;  %v23_v15 = vld [vmem:[%s763_s0 + $0x78] sm:$0xff] }
   0x9   :  { %286 = vperm.xlu0 %493, %v258_v17   ;;  %v211_v20 = vsel %vm186_vm13, 3, %v161_v18  ;;  %vm34_vm15 = vcmp.eq.s32.totalorder %v9_v13, 6  ;;  %vm84_vm0 = vcmp.eq.s32.totalorder %v9_v13, 7  ;;  %vm134_vm1 = vcmp.eq.s32.totalorder %v9_v13, 8 }
   0xa   :  { %v261_v21 = vsel %vm236_vm14, 4, %v211_v20  ;;  %v59_v22 = vsel %vm34_vm15, 0, %v496_v4  ;;  %vm184_vm2 = vcmp.eq.s32.totalorder %v9_v13, 15  ;;  %vm234_vm3 = vcmp.eq.s32.totalorder %v9_v13, 16  ;;  %v22_v20 = vld [vmem:[%s763_s0 + $0x70] sm:$0xff] }
   0xb   :  { %v109_v24 = vsel %vm84_vm0, 1, %v59_v22  ;;  %vm38_vm4 = vcmp.eq.s32.totalorder %v13_v19, 6  ;;  %vm88_vm5 = vcmp.eq.s32.totalorder %v13_v19, 7  ;;  %vm138_vm6 = vcmp.eq.s32.totalorder %v13_v19, 8 }
   0xc   :  { %295 = vperm.xlu1 %494, %v261_v21   ;;  %v159_v25 = vsel %vm134_vm1, 2, %v109_v24  ;;  %v63_v26 = vsel %vm38_vm4, 0, %v496_v4  ;;  %vm188_vm7 = vcmp.eq.s32.totalorder %v13_v19, 15  ;;  %vm238_vm8 = vcmp.eq.s32.totalorder %v13_v19, 16 }
   0xd   :  { %v209_v27 = vsel %vm184_vm2, 3, %v159_v25  ;;  %v113_v28 = vsel %vm88_vm5, 1, %v63_v26  ;;  %vm37_vm9 = vcmp.eq.s32.totalorder %v12_v23, 6  ;;  %vm87_vm10 = vcmp.eq.s32.totalorder %v12_v23, 7 }
   0xe   :  { %v259_v30 = vsel %vm234_vm3, 4, %v209_v27  ;;  %v163_v31 = vsel %vm138_vm6, 2, %v113_v28  ;;  %v62_v32 = vsel %vm37_vm9, 0, %v496_v4  ;;  %vm137_vm11 = vcmp.eq.s32.totalorder %v12_v23, 8  ;;  %v25_v27 = vld [vmem:[%s763_s0 + $0x88] sm:$0xff] }
   0xf   :  { %289 = vperm.xlu0 %493, %v259_v30   ;;  %v213_v33 = vsel %vm188_vm7, 3, %v163_v31  ;;  %v112_v34 = vsel %vm87_vm10, 1, %v62_v32  ;;  %vm187_vm12 = vcmp.eq.s32.totalorder %v12_v23, 15  ;;  %vm237_vm13 = vcmp.eq.s32.totalorder %v12_v23, 16  ;;  %v24_v32 = vld [vmem:[%s763_s0 + $0x80] sm:$0xff] }
  0x10   :  { %v263_v36 = vsel %vm238_vm8, 4, %v213_v33  ;;  %v162_v37 = vsel %vm137_vm11, 2, %v112_v34  ;;  %vm40_vm14 = vcmp.eq.s32.totalorder %v15_v29, 6  ;;  %vm90_vm15 = vcmp.eq.s32.totalorder %v15_v29, 7 }
  0x11   :  { %301 = vperm.xlu1 %494, %v263_v36   ;;  %v212_v38 = vsel %vm187_vm12, 3, %v162_v37  ;;  %v65_v39 = vsel %vm40_vm14, 0, %v496_v4  ;;  %vm140_vm0 = vcmp.eq.s32.totalorder %v15_v29, 8  ;;  %vm190_vm1 = vcmp.eq.s32.totalorder %v15_v29, 15 }
  0x12   :  { %v262_v40 = vsel %vm237_vm13, 4, %v212_v38  ;;  %v115_v41 = vsel %vm90_vm15, 1, %v65_v39  ;;  %vm240_vm2 = vcmp.eq.s32.totalorder %v15_v29, 16  ;;  %vm39_vm3 = vcmp.eq.s32.totalorder %v14_v35, 6  ;;  %v27_v39 = vld [vmem:[%s763_s0 + $0x98] sm:$0xff] }
  0x13   :  { %298 = vperm.xlu0 %493, %v262_v40   ;;  %v165_v43 = vsel %vm140_vm0, 2, %v115_v41  ;;  %v64_v44 = vsel %vm39_vm3, 0, %v496_v4  ;;  %vm89_vm4 = vcmp.eq.s32.totalorder %v14_v35, 7  ;;  %vm139_vm5 = vcmp.eq.s32.totalorder %v14_v35, 8 }
  0x14   :  { %v215_v45 = vsel %vm190_vm1, 3, %v165_v43  ;;  %v114_v46 = vsel %vm89_vm4, 1, %v64_v44  ;;  %vm189_vm6 = vcmp.eq.s32.totalorder %v14_v35, 15  ;;  %vm239_vm7 = vcmp.eq.s32.totalorder %v14_v35, 16  ;;  %v26_v44 = vld [vmem:[%s763_s0 + $0x90] sm:$0xff] }
  0x15   :  { %v265_v48 = vsel %vm240_vm2, 4, %v215_v45  ;;  %v164_v49 = vsel %vm139_vm5, 2, %v114_v46  ;;  %vm42_vm8 = vcmp.eq.s32.totalorder %v17_v42, 6  ;;  %vm92_vm9 = vcmp.eq.s32.totalorder %v17_v42, 7 }
  0x16   :  { %307 = vperm.xlu1 %494, %v265_v48   ;;  %v214_v50 = vsel %vm189_vm6, 3, %v164_v49  ;;  %v67_v51 = vsel %vm42_vm8, 0, %v496_v4  ;;  %vm142_vm10 = vcmp.eq.s32.totalorder %v17_v42, 8  ;;  %vm192_vm11 = vcmp.eq.s32.totalorder %v17_v42, 15 }
  0x17   :  { %v264_v52 = vsel %vm239_vm7, 4, %v214_v50  ;;  %v117_v53 = vsel %vm92_vm9, 1, %v67_v51  ;;  %vm242_vm12 = vcmp.eq.s32.totalorder %v17_v42, 16  ;;  %vm41_vm13 = vcmp.eq.s32.totalorder %v16_v47, 6  ;;  %v29_v51 = vld [vmem:[%s763_s0 + $0xa8] sm:$0xff] }
  0x18   :  { %304 = vperm.xlu0 %493, %v264_v52   ;;  %v167_v55 = vsel %vm142_vm10, 2, %v117_v53  ;;  %v66_v56 = vsel %vm41_vm13, 0, %v496_v4  ;;  %vm91_vm14 = vcmp.eq.s32.totalorder %v16_v47, 7  ;;  %vm141_vm15 = vcmp.eq.s32.totalorder %v16_v47, 8 }
  0x19   :  { %v217_v57 = vsel %vm192_vm11, 3, %v167_v55  ;;  %v116_v58 = vsel %vm91_vm14, 1, %v66_v56  ;;  %vm191_vm0 = vcmp.eq.s32.totalorder %v16_v47, 15  ;;  %vm241_vm1 = vcmp.eq.s32.totalorder %v16_v47, 16  ;;  %v28_v56 = vld [vmem:[%s763_s0 + $0xa0] sm:$0xff] }
  0x1a   :  { %v267_v60 = vsel %vm242_vm12, 4, %v217_v57  ;;  %v166_v61 = vsel %vm141_vm15, 2, %v116_v58  ;;  %vm44_vm2 = vcmp.eq.s32.totalorder %v19_v54, 6  ;;  %vm94_vm3 = vcmp.eq.s32.totalorder %v19_v54, 7 }
  0x1b   :  { %313 = vperm.xlu1 %494, %v267_v60   ;;  %v216_v62 = vsel %vm191_vm0, 3, %v166_v61  ;;  %v69_v63 = vsel %vm44_vm2, 0, %v496_v4  ;;  %vm144_vm4 = vcmp.eq.s32.totalorder %v19_v54, 8  ;;  %vm194_vm5 = vcmp.eq.s32.totalorder %v19_v54, 15 }
  0x1c   :  { %v266_v0 = vsel %vm241_vm1, 4, %v216_v62  ;;  %v119_v1 = vsel %vm94_vm3, 1, %v69_v63  ;;  %vm244_vm6 = vcmp.eq.s32.totalorder %v19_v54, 16  ;;  %vm43_vm7 = vcmp.eq.s32.totalorder %v18_v59, 6  ;;  %v31_v63 = vld [vmem:[%s763_s0 + $0xb8] sm:$0xff] }
  0x1d   :  { %310 = vperm.xlu0 %493, %v266_v0   ;;  %v169_v3 = vsel %vm144_vm4, 2, %v119_v1  ;;  %v68_v5 = vsel %vm43_vm7, 0, %v496_v4  ;;  %vm93_vm8 = vcmp.eq.s32.totalorder %v18_v59, 7  ;;  %vm143_vm9 = vcmp.eq.s32.totalorder %v18_v59, 8 }
  0x1e   :  { %v219_v6 = vsel %vm194_vm5, 3, %v169_v3  ;;  %v118_v7 = vsel %vm93_vm8, 1, %v68_v5  ;;  %vm193_vm10 = vcmp.eq.s32.totalorder %v18_v59, 15  ;;  %vm243_vm11 = vcmp.eq.s32.totalorder %v18_v59, 16  ;;  %v30_v5 = vld [vmem:[%s763_s0 + $0xb0] sm:$0xff] }
  0x1f   :  { %v269_v9 = vsel %vm244_vm6, 4, %v219_v6  ;;  %v168_v10 = vsel %vm143_vm9, 2, %v118_v7  ;;  %vm46_vm12 = vcmp.eq.s32.totalorder %v21_v2, 6  ;;  %vm96_vm13 = vcmp.eq.s32.totalorder %v21_v2, 7 }
  0x20   :  { %319 = vperm.xlu1 %494, %v269_v9   ;;  %v218_v11 = vsel %vm193_vm10, 3, %v168_v10  ;;  %v71_v12 = vsel %vm46_vm12, 0, %v496_v4  ;;  %vm146_vm14 = vcmp.eq.s32.totalorder %v21_v2, 8  ;;  %vm196_vm15 = vcmp.eq.s32.totalorder %v21_v2, 15 }
  0x21   :  { %v268_v13 = vsel %vm243_vm11, 4, %v218_v11  ;;  %v121_v14 = vsel %vm96_vm13, 1, %v71_v12  ;;  %vm246_vm0 = vcmp.eq.s32.totalorder %v21_v2, 16  ;;  %vm45_vm1 = vcmp.eq.s32.totalorder %v20_v8, 6  ;;  %v32_v12 = vld [vmem:[%s763_s0 + $0xc0] sm:$0xff] }
  0x22   :  { %316 = vperm.xlu0 %493, %v268_v13   ;;  %v171_v16 = vsel %vm146_vm14, 2, %v121_v14  ;;  %v70_v17 = vsel %vm45_vm1, 0, %v496_v4  ;;  %vm95_vm2 = vcmp.eq.s32.totalorder %v20_v8, 7  ;;  %vm145_vm3 = vcmp.eq.s32.totalorder %v20_v8, 8 }
  0x23   :  { %v221_v18 = vsel %vm196_vm15, 3, %v171_v16  ;;  %v120_v19 = vsel %vm95_vm2, 1, %v70_v17  ;;  %vm195_vm4 = vcmp.eq.s32.totalorder %v20_v8, 15  ;;  %vm245_vm5 = vcmp.eq.s32.totalorder %v20_v8, 16 }
  0x24   :  { %v271_v21 = vsel %vm246_vm0, 4, %v221_v18  ;;  %v170_v22 = vsel %vm145_vm3, 2, %v120_v19  ;;  %vm48_vm6 = vcmp.eq.s32.totalorder %v23_v15, 6  ;;  %vm98_vm7 = vcmp.eq.s32.totalorder %v23_v15, 7 }
  0x25   :  { %325 = vperm.xlu1 %494, %v271_v21   ;;  %v220_v23 = vsel %vm195_vm4, 3, %v170_v22  ;;  %v73_v24 = vsel %vm48_vm6, 0, %v496_v4  ;;  %vm148_vm8 = vcmp.eq.s32.totalorder %v23_v15, 8  ;;  %vm198_vm9 = vcmp.eq.s32.totalorder %v23_v15, 15 }
  0x26   :  { %v270_v25 = vsel %vm245_vm5, 4, %v220_v23  ;;  %v123_v26 = vsel %vm98_vm7, 1, %v73_v24  ;;  %vm248_vm10 = vcmp.eq.s32.totalorder %v23_v15, 16  ;;  %vm47_vm11 = vcmp.eq.s32.totalorder %v22_v20, 6 }
  0x27   :  { %322 = vperm.xlu0 %493, %v270_v25   ;;  %v173_v28 = vsel %vm148_vm8, 2, %v123_v26  ;;  %v72_v29 = vsel %vm47_vm11, 0, %v496_v4  ;;  %vm97_vm12 = vcmp.eq.s32.totalorder %v22_v20, 7  ;;  %vm147_vm13 = vcmp.eq.s32.totalorder %v22_v20, 8 }
  0x28   :  { %v223_v30 = vsel %vm198_vm9, 3, %v173_v28  ;;  %v122_v31 = vsel %vm97_vm12, 1, %v72_v29  ;;  %vm197_vm14 = vcmp.eq.s32.totalorder %v22_v20, 15  ;;  %vm247_vm15 = vcmp.eq.s32.totalorder %v22_v20, 16 }
  0x29   :  { %v273_v33 = vsel %vm248_vm10, 4, %v223_v30  ;;  %v172_v34 = vsel %vm147_vm13, 2, %v122_v31  ;;  %vm50_vm0 = vcmp.eq.s32.totalorder %v25_v27, 6  ;;  %vm100_vm1 = vcmp.eq.s32.totalorder %v25_v27, 7 }
  0x2a   :  { %331 = vperm.xlu1 %494, %v273_v33   ;;  %v222_v35 = vsel %vm197_vm14, 3, %v172_v34  ;;  %v75_v36 = vsel %vm50_vm0, 0, %v496_v4  ;;  %vm150_vm2 = vcmp.eq.s32.totalorder %v25_v27, 8  ;;  %vm200_vm3 = vcmp.eq.s32.totalorder %v25_v27, 15 }
  0x2b   :  { %v272_v37 = vsel %vm247_vm15, 4, %v222_v35  ;;  %v125_v38 = vsel %vm100_vm1, 1, %v75_v36  ;;  %vm250_vm4 = vcmp.eq.s32.totalorder %v25_v27, 16  ;;  %vm49_vm5 = vcmp.eq.s32.totalorder %v24_v32, 6 }
  0x2c   :  { %328 = vperm.xlu0 %493, %v272_v37   ;;  %v175_v40 = vsel %vm150_vm2, 2, %v125_v38  ;;  %v74_v41 = vsel %vm49_vm5, 0, %v496_v4  ;;  %vm99_vm6 = vcmp.eq.s32.totalorder %v24_v32, 7  ;;  %vm149_vm7 = vcmp.eq.s32.totalorder %v24_v32, 8 }
  0x2d   :  { %v225_v42 = vsel %vm200_vm3, 3, %v175_v40  ;;  %v124_v43 = vsel %vm99_vm6, 1, %v74_v41  ;;  %vm199_vm8 = vcmp.eq.s32.totalorder %v24_v32, 15  ;;  %vm249_vm9 = vcmp.eq.s32.totalorder %v24_v32, 16 }
  0x2e   :  { %v275_v45 = vsel %vm250_vm4, 4, %v225_v42  ;;  %v174_v46 = vsel %vm149_vm7, 2, %v124_v43  ;;  %vm52_vm10 = vcmp.eq.s32.totalorder %v27_v39, 6  ;;  %vm102_vm11 = vcmp.eq.s32.totalorder %v27_v39, 7 }
  0x2f   :  { %337 = vperm.xlu1 %494, %v275_v45   ;;  %v224_v47 = vsel %vm199_vm8, 3, %v174_v46  ;;  %v77_v48 = vsel %vm52_vm10, 0, %v496_v4  ;;  %vm152_vm12 = vcmp.eq.s32.totalorder %v27_v39, 8  ;;  %vm202_vm13 = vcmp.eq.s32.totalorder %v27_v39, 15 }
  0x30   :  { %v274_v49 = vsel %vm249_vm9, 4, %v224_v47  ;;  %v127_v50 = vsel %vm102_vm11, 1, %v77_v48  ;;  %vm252_vm14 = vcmp.eq.s32.totalorder %v27_v39, 16  ;;  %vm51_vm15 = vcmp.eq.s32.totalorder %v26_v44, 6 }
  0x31   :  { %334 = vperm.xlu0 %493, %v274_v49   ;;  %v177_v52 = vsel %vm152_vm12, 2, %v127_v50  ;;  %v76_v53 = vsel %vm51_vm15, 0, %v496_v4  ;;  %vm101_vm0 = vcmp.eq.s32.totalorder %v26_v44, 7  ;;  %vm151_vm1 = vcmp.eq.s32.totalorder %v26_v44, 8 }
  0x32   :  { %v227_v54 = vsel %vm202_vm13, 3, %v177_v52  ;;  %v126_v55 = vsel %vm101_vm0, 1, %v76_v53  ;;  %vm201_vm2 = vcmp.eq.s32.totalorder %v26_v44, 15  ;;  %vm251_vm3 = vcmp.eq.s32.totalorder %v26_v44, 16 }
  0x33   :  { %v277_v57 = vsel %vm252_vm14, 4, %v227_v54  ;;  %v176_v58 = vsel %vm151_vm1, 2, %v126_v55  ;;  %vm54_vm4 = vcmp.eq.s32.totalorder %v29_v51, 6  ;;  %vm104_vm5 = vcmp.eq.s32.totalorder %v29_v51, 7 }
  0x34   :  { %343 = vperm.xlu1 %494, %v277_v57   ;;  %v226_v59 = vsel %vm201_vm2, 3, %v176_v58  ;;  %v79_v60 = vsel %vm54_vm4, 0, %v496_v4  ;;  %vm154_vm6 = vcmp.eq.s32.totalorder %v29_v51, 8  ;;  %vm204_vm7 = vcmp.eq.s32.totalorder %v29_v51, 15 }
  0x35   :  { %v276_v61 = vsel %vm251_vm3, 4, %v226_v59  ;;  %v129_v62 = vsel %vm104_vm5, 1, %v79_v60  ;;  %vm254_vm8 = vcmp.eq.s32.totalorder %v29_v51, 16  ;;  %vm53_vm9 = vcmp.eq.s32.totalorder %v28_v56, 6 }
  0x36   :  { %340 = vperm.xlu0 %493, %v276_v61   ;;  %v179_v0 = vsel %vm154_vm6, 2, %v129_v62  ;;  %v78_v1 = vsel %vm53_vm9, 0, %v496_v4  ;;  %vm103_vm10 = vcmp.eq.s32.totalorder %v28_v56, 7  ;;  %vm153_vm11 = vcmp.eq.s32.totalorder %v28_v56, 8 }
  0x37   :  { %v229_v2 = vsel %vm204_vm7, 3, %v179_v0  ;;  %v128_v3 = vsel %vm103_vm10, 1, %v78_v1  ;;  %vm203_vm12 = vcmp.eq.s32.totalorder %v28_v56, 15  ;;  %vm253_vm13 = vcmp.eq.s32.totalorder %v28_v56, 16 }
  0x38   :  { %v279_v6 = vsel %vm254_vm8, 4, %v229_v2  ;;  %v178_v7 = vsel %vm153_vm11, 2, %v128_v3  ;;  %vm56_vm14 = vcmp.eq.s32.totalorder %v31_v63, 6  ;;  %vm106_vm15 = vcmp.eq.s32.totalorder %v31_v63, 7 }
  0x39   :  { %349 = vperm.xlu1 %494, %v279_v6   ;;  %v228_v8 = vsel %vm203_vm12, 3, %v178_v7  ;;  %v81_v9 = vsel %vm56_vm14, 0, %v496_v4  ;;  %vm156_vm0 = vcmp.eq.s32.totalorder %v31_v63, 8  ;;  %vm206_vm1 = vcmp.eq.s32.totalorder %v31_v63, 15 }
  0x3a   :  { %v278_v10 = vsel %vm253_vm13, 4, %v228_v8  ;;  %v131_v11 = vsel %vm106_vm15, 1, %v81_v9  ;;  %vm256_vm2 = vcmp.eq.s32.totalorder %v31_v63, 16  ;;  %vm55_vm3 = vcmp.eq.s32.totalorder %v30_v5, 6 }
  0x3b   :  { %346 = vperm.xlu0 %493, %v278_v10   ;;  %v181_v13 = vsel %vm156_vm0, 2, %v131_v11  ;;  %v80_v14 = vsel %vm55_vm3, 0, %v496_v4  ;;  %vm105_vm4 = vcmp.eq.s32.totalorder %v30_v5, 7  ;;  %vm155_vm5 = vcmp.eq.s32.totalorder %v30_v5, 8 }
  0x3c   :  { %v231_v15 = vsel %vm206_vm1, 3, %v181_v13  ;;  %v130_v16 = vsel %vm105_vm4, 1, %v80_v14  ;;  %vm205_vm6 = vcmp.eq.s32.totalorder %v30_v5, 15  ;;  %vm255_vm7 = vcmp.eq.s32.totalorder %v30_v5, 16 }
  0x3d   :  { %v281_v17 = vsel %vm256_vm2, 4, %v231_v15  ;;  %v180_v18 = vsel %vm155_vm5, 2, %v130_v16  ;;  %vm57_vm8 = vcmp.eq.s32.totalorder %v32_v12, 6  ;;  %vm107_vm9 = vcmp.eq.s32.totalorder %v32_v12, 7 }
  0x3e   :  { %355 = vperm.xlu1 %494, %v281_v17   ;;  %v230_v19 = vsel %vm205_vm6, 3, %v180_v18  ;;  %v82_v20 = vsel %vm57_vm8, 0, %v496_v4  ;;  %vm157_vm10 = vcmp.eq.s32.totalorder %v32_v12, 8  ;;  %vm207_vm11 = vcmp.eq.s32.totalorder %v32_v12, 15 }
  0x3f   :  { %v280_v21 = vsel %vm255_vm7, 4, %v230_v19  ;;  %v132_v22 = vsel %vm107_vm9, 1, %v82_v20  ;;  %vm257_vm12 = vcmp.eq.s32.totalorder %v32_v12, 16  ;;  %v283_v26 = vlaneseq }
  0x40   :  { %352 = vperm.xlu0 %493, %v280_v21   ;;  %v182_v23 = vsel %vm157_vm10, 2, %v132_v22  ;;  %vm435_vm13 = vcmask 48128   ;;  %v497_v30 = vmov 0.0  }
  0x41   :  { %v232_v24 = vsel %vm207_vm11, 3, %v182_v23  ;;  %v611_v27 = vand.u32 127, %v283_v26 }
  0x42   :  { %v282_v25 = vsel %vm257_vm12, 4, %v232_v24 }
  0x44   :  { %358 = vperm.xlu0 %493, %v282_v25  }
  0x87   :  { %v293_v28 = vpop.permute.xlu1 %292 }
  0x88   :  { %vm362_vm14 = vcmp.eq.s32.totalorder %v611_v27, %v293_v28  ;;  %v287_v29 = vpop.permute.xlu0 %286 }
  0x89   :  { %v467_v4 = vsel %vm362_vm14, 1.0, %v497_v30  ;;  %vm360_vm15 = vcmp.eq.s32.totalorder %v611_v27, %v287_v29 }
  0x8a   :  { %438 = vst.msk [vmem:[%s764_s1 + $0x10] sm:$0xff] %vm435_vm13, %v467_v4  ;;  %v465_v31 = vsel %vm360_vm15, 1.0, %v497_v30 }
  0x8b   :  { %436 = vst.msk [vmem:[%s764_s1] sm:$0xff] %vm435_vm13, %v465_v31  ;;  %v296_v32 = vpop.permute.xlu1 %295 }
  0x8c   :  { %vm363_vm0 = vcmp.eq.s32.totalorder %v611_v27, %v296_v32 }
  0x8d   :  { %v468_v33 = vsel %vm363_vm0, 1.0, %v497_v30 }
  0x8e   :  { %439 = vst.msk [vmem:[%s764_s1 + $0x18] sm:$0xff] %vm435_vm13, %v468_v33  ;;  %v290_v34 = vpop.permute.xlu0 %289 }
  0x8f   :  { %vm361_vm1 = vcmp.eq.s32.totalorder %v611_v27, %v290_v34 }
  0x90   :  { %v466_v35 = vsel %vm361_vm1, 1.0, %v497_v30  ;;  %v302_v36 = vpop.permute.xlu1 %301 }
  0x91   :  { %437 = vst.msk [vmem:[%s764_s1 + $0x8] sm:$0xff] %vm435_vm13, %v466_v35  ;;  %vm365_vm2 = vcmp.eq.s32.totalorder %v611_v27, %v302_v36 }
  0x92   :  { %v470_v37 = vsel %vm365_vm2, 1.0, %v497_v30  ;;  %v299_v38 = vpop.permute.xlu0 %298 }
  0x93   :  { %441 = vst.msk [vmem:[%s764_s1 + $0x28] sm:$0xff] %vm435_vm13, %v470_v37  ;;  %vm364_vm3 = vcmp.eq.s32.totalorder %v611_v27, %v299_v38 }
  0x94   :  { %v469_v39 = vsel %vm364_vm3, 1.0, %v497_v30 }
  0x95   :  { %440 = vst.msk [vmem:[%s764_s1 + $0x20] sm:$0xff] %vm435_vm13, %v469_v39  ;;  %v308_v40 = vpop.permute.xlu1 %307 }
  0x96   :  { %vm367_vm4 = vcmp.eq.s32.totalorder %v611_v27, %v308_v40 }
  0x97   :  { %v472_v41 = vsel %vm367_vm4, 1.0, %v497_v30  ;;  %v305_v42 = vpop.permute.xlu0 %304 }
  0x98   :  { %443 = vst.msk [vmem:[%s764_s1 + $0x38] sm:$0xff] %vm435_vm13, %v472_v41  ;;  %vm366_vm5 = vcmp.eq.s32.totalorder %v611_v27, %v305_v42 }
  0x99   :  { %v471_v43 = vsel %vm366_vm5, 1.0, %v497_v30 }
  0x9a   :  { %442 = vst.msk [vmem:[%s764_s1 + $0x30] sm:$0xff] %vm435_vm13, %v471_v43  ;;  %v314_v44 = vpop.permute.xlu1 %313 }
  0x9b   :  { %vm369_vm6 = vcmp.eq.s32.totalorder %v611_v27, %v314_v44 }
  0x9c   :  { %v474_v45 = vsel %vm369_vm6, 1.0, %v497_v30  ;;  %v311_v46 = vpop.permute.xlu0 %310 }
  0x9d   :  { %445 = vst.msk [vmem:[%s764_s1 + $0x48] sm:$0xff] %vm435_vm13, %v474_v45  ;;  %vm368_vm7 = vcmp.eq.s32.totalorder %v611_v27, %v311_v46 }
  0x9e   :  { %v473_v47 = vsel %vm368_vm7, 1.0, %v497_v30 }
  0x9f   :  { %444 = vst.msk [vmem:[%s764_s1 + $0x40] sm:$0xff] %vm435_vm13, %v473_v47  ;;  %v320_v48 = vpop.permute.xlu1 %319 }
  0xa0   :  { %vm371_vm8 = vcmp.eq.s32.totalorder %v611_v27, %v320_v48 }
  0xa1   :  { %v476_v49 = vsel %vm371_vm8, 1.0, %v497_v30  ;;  %v317_v50 = vpop.permute.xlu0 %316 }
  0xa2   :  { %447 = vst.msk [vmem:[%s764_s1 + $0x58] sm:$0xff] %vm435_vm13, %v476_v49  ;;  %vm370_vm9 = vcmp.eq.s32.totalorder %v611_v27, %v317_v50 }
  0xa3   :  { %v475_v51 = vsel %vm370_vm9, 1.0, %v497_v30 }
  0xa4   :  { %446 = vst.msk [vmem:[%s764_s1 + $0x50] sm:$0xff] %vm435_vm13, %v475_v51  ;;  %v326_v52 = vpop.permute.xlu1 %325 }
  0xa5   :  { %vm373_vm10 = vcmp.eq.s32.totalorder %v611_v27, %v326_v52 }
  0xa6   :  { %v478_v53 = vsel %vm373_vm10, 1.0, %v497_v30  ;;  %v323_v54 = vpop.permute.xlu0 %322 }
  0xa7   :  { %449 = vst.msk [vmem:[%s764_s1 + $0x68] sm:$0xff] %vm435_vm13, %v478_v53  ;;  %vm372_vm11 = vcmp.eq.s32.totalorder %v611_v27, %v323_v54 }
  0xa8   :  { %v477_v55 = vsel %vm372_vm11, 1.0, %v497_v30 }
  0xa9   :  { %448 = vst.msk [vmem:[%s764_s1 + $0x60] sm:$0xff] %vm435_vm13, %v477_v55  ;;  %v332_v56 = vpop.permute.xlu1 %331 }
  0xaa   :  { %vm375_vm12 = vcmp.eq.s32.totalorder %v611_v27, %v332_v56 }
  0xab   :  { %v480_v57 = vsel %vm375_vm12, 1.0, %v497_v30  ;;  %v329_v58 = vpop.permute.xlu0 %328 }
  0xac   :  { %451 = vst.msk [vmem:[%s764_s1 + $0x78] sm:$0xff] %vm435_vm13, %v480_v57  ;;  %vm374_vm14 = vcmp.eq.s32.totalorder %v611_v27, %v329_v58 }
  0xad   :  { %v479_v59 = vsel %vm374_vm14, 1.0, %v497_v30 }
  0xae   :  { %450 = vst.msk [vmem:[%s764_s1 + $0x70] sm:$0xff] %vm435_vm13, %v479_v59  ;;  %v338_v60 = vpop.permute.xlu1 %337 }
  0xaf   :  { %vm377_vm15 = vcmp.eq.s32.totalorder %v611_v27, %v338_v60 }
  0xb0   :  { %v482_v61 = vsel %vm377_vm15, 1.0, %v497_v30  ;;  %v335_v62 = vpop.permute.xlu0 %334 }
  0xb1   :  { %453 = vst.msk [vmem:[%s764_s1 + $0x88] sm:$0xff] %vm435_vm13, %v482_v61  ;;  %vm376_vm0 = vcmp.eq.s32.totalorder %v611_v27, %v335_v62 }
  0xb2   :  { %v481_v63 = vsel %vm376_vm0, 1.0, %v497_v30 }
  0xb3   :  { %452 = vst.msk [vmem:[%s764_s1 + $0x80] sm:$0xff] %vm435_vm13, %v481_v63  ;;  %v344_v0 = vpop.permute.xlu1 %343 }
  0xb4   :  { %vm379_vm1 = vcmp.eq.s32.totalorder %v611_v27, %v344_v0 }
  0xb5   :  { %v484_v1 = vsel %vm379_vm1, 1.0, %v497_v30  ;;  %v341_v2 = vpop.permute.xlu0 %340 }
  0xb6   :  { %455 = vst.msk [vmem:[%s764_s1 + $0x98] sm:$0xff] %vm435_vm13, %v484_v1  ;;  %vm378_vm2 = vcmp.eq.s32.totalorder %v611_v27, %v341_v2 }
  0xb7   :  { %v483_v3 = vsel %vm378_vm2, 1.0, %v497_v30 }
  0xb8   :  { %454 = vst.msk [vmem:[%s764_s1 + $0x90] sm:$0xff] %vm435_vm13, %v483_v3  ;;  %v350_v5 = vpop.permute.xlu1 %349 }
  0xb9   :  { %vm381_vm3 = vcmp.eq.s32.totalorder %v611_v27, %v350_v5 }
  0xba   :  { %v486_v6 = vsel %vm381_vm3, 1.0, %v497_v30  ;;  %v347_v7 = vpop.permute.xlu0 %346 }
  0xbb   :  { %457 = vst.msk [vmem:[%s764_s1 + $0xa8] sm:$0xff] %vm435_vm13, %v486_v6  ;;  %vm380_vm4 = vcmp.eq.s32.totalorder %v611_v27, %v347_v7 }
  0xbc   :  { %v485_v8 = vsel %vm380_vm4, 1.0, %v497_v30 }
  0xbd   :  { %456 = vst.msk [vmem:[%s764_s1 + $0xa0] sm:$0xff] %vm435_vm13, %v485_v8  ;;  %v356_v9 = vpop.permute.xlu1 %355 }
  0xbe   :  { %vm383_vm5 = vcmp.eq.s32.totalorder %v611_v27, %v356_v9 }
  0xbf   :  { %v488_v10 = vsel %vm383_vm5, 1.0, %v497_v30  ;;  %v353_v11 = vpop.permute.xlu0 %352 }
  0xc0   :  { %459 = vst.msk [vmem:[%s764_s1 + $0xb8] sm:$0xff] %vm435_vm13, %v488_v10  ;;  %vm382_vm6 = vcmp.eq.s32.totalorder %v611_v27, %v353_v11 }
  0xc1   :  { %v487_v12 = vsel %vm382_vm6, 1.0, %v497_v30 }
  0xc2   :  { %458 = vst.msk [vmem:[%s764_s1 + $0xb0] sm:$0xff] %vm435_vm13, %v487_v12 }
  0xc3   :  { %v359_v13 = vpop.permute.xlu0 %358 }
  0xc4   :  { %vm384_vm7 = vcmp.eq.s32.totalorder %v611_v27, %v359_v13 }
  0xc5   :  { %v489_v14 = vsel %vm384_vm7, 1.0, %v497_v30 }
  0xc6   :  { %460 = vst.msk [vmem:[%s764_s1 + $0xc0] sm:$0xff] %vm435_vm13, %v489_v14 }

</bundles_post_ra>
